<compile_context>
chip_gen: v5e
topology: v5e:2x2
jax: 0.10.0
libtpu: 0.0.40
codegen_flags: <defaults>
</compile_context>

<pallas_src>
import functools

import jax
import jax.numpy as jnp
from jax.experimental import pallas as pl
from jax.experimental.pallas import tpu as pltpu


def _round_up(x, m):
    return ((x + m - 1) // m) * m


def qnetwork_kernel(x_ref, w1_ref, b1_ref, w2_ref, b2_ref, w3_ref, b3_ref, o_ref):
    # On-chip cast of the streamed f32 rows to bf16 (hidden under the DMAs).
    x = x_ref[...].astype(jnp.bfloat16)

    # hidden layer 1: Linear(input_size, 64) + ReLU   (bf16 MXU matmul, f32 accum)
    h1 = jnp.dot(x, w1_ref[...], preferred_element_type=jnp.float32)
    h1 = jnp.maximum(h1 + b1_ref[...], 0.0)

    # hidden layer 2: Linear(64, 64) + ReLU
    h2 = jnp.dot(h1.astype(w2_ref.dtype), w2_ref[...],
                 preferred_element_type=jnp.float32)
    h2 = jnp.maximum(h2 + b2_ref[...], 0.0)

    # output layer: Linear(64, output_size)
    logits = jnp.dot(h2.astype(w3_ref.dtype), w3_ref[...],
                     preferred_element_type=jnp.float32)
    logits = logits + b3_ref[...]

    # Softmax(dim=-1), numerically stable; approx reciprocal runs on the EUP.
    m = jnp.max(logits, axis=-1, keepdims=True)
    e = jnp.exp(logits - m)
    denom = jnp.sum(e, axis=-1, keepdims=True)
    o_ref[...] = (e * pl.reciprocal(denom, approx=True)).astype(o_ref.dtype)


@functools.partial(jax.jit, static_argnames=("tb_max", "min_steps"))
def qnetwork_forward(x, params, *, tb_max=2048, min_steps=8):
    """x: (B, input_size) f32. Returns (B, output_size) f32 softmax probabilities."""
    w1, b1, w2, b2, w3, b3 = params
    B, F = x.shape
    out_size = w3.shape[1]
    compute_dtype = jnp.bfloat16

    # Batch tile: big enough to amortize per-step overhead, small enough to keep
    # >= min_steps grid steps at large B (v7x megacore). Multiple of 8 (f32
    # sublane); never larger than the (rounded-up) batch.
    tb = _round_up(pl.cdiv(B, min_steps), 8)
    tb = max(tb, 128)
    tb = min(tb, tb_max)
    tb = min(tb, _round_up(B, 8))
    grid = (pl.cdiv(B, tb),)   # ragged last tile handled by Pallas (masked writeback)

    # Weights stream once and stay VMEM-resident; biases stay f32.
    w1c = w1.astype(compute_dtype)
    w2c = w2.astype(compute_dtype)
    w3c = w3.astype(compute_dtype)

    resident = lambda a: pl.BlockSpec(a.shape, lambda i: (0,) * a.ndim)

    out = pl.pallas_call(
        qnetwork_kernel,
        out_shape=jax.ShapeDtypeStruct((B, out_size), jnp.float32),
        grid=grid,
        in_specs=[
            pl.BlockSpec((tb, F), lambda i: (i, 0)),   # x: f32, streamed per batch tile
            resident(w1c), resident(b1),
            resident(w2c), resident(b2),
            resident(w3c), resident(b3),
        ],
        out_specs=pl.BlockSpec((tb, out_size), lambda i: (i, 0)),  # direct (B, out) store
        compiler_params=pltpu.CompilerParams(
            dimension_semantics=("parallel",),          # both TCs on v7x
            vmem_limit_bytes=32 * 1024 * 1024,          # far above actual use (~3 MiB)
        ),
    )(x, w1c, b1, w2c, b2, w3c, b3)

    return out


def init_params(key, input_size, output_size, hidden=64):
    # Mimics PyTorch's default Linear init: U(-1/sqrt(fan_in), 1/sqrt(fan_in)).
    ks = jax.random.split(key, 6)

    def lin(kw, kb, fan_in, fan_out):
        bound = 1.0 / jnp.sqrt(fan_in)
        w = jax.random.uniform(kw, (fan_in, fan_out), jnp.float32, -bound, bound)
        b = jax.random.uniform(kb, (1, fan_out), jnp.float32, -bound, bound)
        return w, b

    w1, b1 = lin(ks[0], ks[1], input_size, hidden)
    w2, b2 = lin(ks[2], ks[3], hidden, hidden)
    w3, b3 = lin(ks[4], ks[5], hidden, output_size)
    return (w1, b1, w2, b2, w3, b3)


def reference_forward(x, params, compute_dtype=jnp.float32):
    """Pure-JAX reference; compute_dtype lets us match the kernel's bf16 matmuls."""
    w1, b1, w2, b2, w3, b3 = params
    xc = x.astype(compute_dtype)
    h1 = jnp.maximum(
        jnp.dot(xc, w1.astype(compute_dtype), preferred_element_type=jnp.float32) + b1, 0.0)
    h2 = jnp.maximum(
        jnp.dot(h1.astype(compute_dtype), w2.astype(compute_dtype),
                preferred_element_type=jnp.float32) + b2, 0.0)
    logits = jnp.dot(h2.astype(compute_dtype), w3.astype(compute_dtype),
                     preferred_element_type=jnp.float32) + b3
    return jax.nn.softmax(logits, axis=-1)


if __name__ == "__main__":
    key = jax.random.PRNGKey(0)
    k_x, k_x2, k_p = jax.random.split(key, 3)

    input_size = 32
    output_size = 4
    params = init_params(k_p, input_size, output_size)

    # --- small case (single grid step, tb clamped to the batch) ---
    batch = 8
    x = jax.random.normal(k_x, (batch, input_size), jnp.float32)
    out = jax.block_until_ready(qnetwork_forward(x, params))
    assert out.shape == (batch, output_size)

    ref_bf16 = reference_forward(x, params, compute_dtype=jnp.bfloat16)
    ref_f32 = reference_forward(x, params, compute_dtype=jnp.float32)
    assert jnp.allclose(out, ref_bf16, atol=5e-3, rtol=5e-3)
    assert jnp.allclose(out, ref_f32, atol=4e-2, rtol=4e-2)
    assert jnp.allclose(jnp.sum(out, axis=-1), jnp.ones((batch,)), atol=1e-2)

    # --- batched case (multiple grid steps + ragged last tile, no wrapper pad) ---
    batch2 = 300
    x2 = jax.random.normal(k_x2, (batch2, input_size), jnp.float32)
    out2 = jax.block_until_ready(qnetwork_forward(x2, params))
    ref2 = reference_forward(x2, params, compute_dtype=jnp.bfloat16)
    assert out2.shape == (batch2, output_size)
    assert jnp.allclose(out2, ref2, atol=5e-3, rtol=5e-3)
    assert jnp.allclose(jnp.sum(out2, axis=-1), jnp.ones((batch2,)), atol=1e-2)

    print("KERNEL_OK")
</pallas_src>

<mosaic_0001>
module attributes {stable_mosaic.version = 11 : i64} {
  func.func @qnetwork_kernel(%arg0: i32, %arg1: memref<8x32xf32, #tpu.memory_space<vmem>>, %arg2: memref<32x64xbf16, #tpu.memory_space<vmem>>, %arg3: memref<1x64xf32, #tpu.memory_space<vmem>>, %arg4: memref<64x64xbf16, #tpu.memory_space<vmem>>, %arg5: memref<1x64xf32, #tpu.memory_space<vmem>>, %arg6: memref<64x4xbf16, #tpu.memory_space<vmem>>, %arg7: memref<1x4xf32, #tpu.memory_space<vmem>>, %arg8: memref<8x4xf32, #tpu.memory_space<vmem>>) attributes {dimension_semantics = [#tpu.dimension_semantics<parallel>], iteration_bounds = array<i64: 1>, scalar_prefetch = 0 : i64, scratch_operands = 0 : i64, tpu.core_type = #tpu.core_type<tc>, window_params = [{transform_indices = @transform_0, window_bounds = array<i64: 8, 32>}, {pipeline_mode = #tpu.pipeline_mode<synchronous>, transform_indices = @transform_1, window_bounds = array<i64: 32, 64>}, {pipeline_mode = #tpu.pipeline_mode<synchronous>, transform_indices = @transform_2, window_bounds = array<i64: 1, 64>}, {pipeline_mode = #tpu.pipeline_mode<synchronous>, transform_indices = @transform_3, window_bounds = array<i64: 64, 64>}, {pipeline_mode = #tpu.pipeline_mode<synchronous>, transform_indices = @transform_4, window_bounds = array<i64: 1, 64>}, {pipeline_mode = #tpu.pipeline_mode<synchronous>, transform_indices = @transform_5, window_bounds = array<i64: 64, 4>}, {pipeline_mode = #tpu.pipeline_mode<synchronous>, transform_indices = @transform_6, window_bounds = array<i64: 1, 4>}, {transform_indices = @transform_7, window_bounds = array<i64: 8, 4>}]} {
    %c0 = arith.constant 0 : index
    %c0_0 = arith.constant 0 : index
    %0 = vector.load %arg1[%c0, %c0_0] : memref<8x32xf32, #tpu.memory_space<vmem>>, vector<8x32xf32>
    %1 = arith.truncf %0 : vector<8x32xf32> to vector<8x32xbf16>
    %c0_1 = arith.constant 0 : index
    %c0_2 = arith.constant 0 : index
    %2 = vector.load %arg2[%c0_1, %c0_2] : memref<32x64xbf16, #tpu.memory_space<vmem>>, vector<32x64xbf16>
    %cst = arith.constant dense<0.000000e+00> : vector<8x64xf32>
    %3 = tpu.matmul %1, %2, %cst {dimension_numbers = #tpu.dot_dimension_numbers<[1], [0], [0], [1], [0, 0, 1, 1], [], []>} : vector<8x32xbf16>, vector<32x64xbf16>, vector<8x64xf32> -> vector<8x64xf32>
    %c0_3 = arith.constant 0 : index
    %c0_4 = arith.constant 0 : index
    %4 = vector.load %arg3[%c0_3, %c0_4] : memref<1x64xf32, #tpu.memory_space<vmem>>, vector<1x64xf32>
    %5 = vector.broadcast %4 : vector<1x64xf32> to vector<8x64xf32>
    %6 = arith.addf %3, %5 : vector<8x64xf32>
    %cst_5 = arith.constant 0.000000e+00 : f32
    %7 = vector.broadcast %cst_5 : f32 to vector<8x64xf32>
    %8 = arith.maximumf %6, %7 : vector<8x64xf32>
    %9 = arith.truncf %8 : vector<8x64xf32> to vector<8x64xbf16>
    %c0_6 = arith.constant 0 : index
    %c0_7 = arith.constant 0 : index
    %10 = vector.load %arg4[%c0_6, %c0_7] : memref<64x64xbf16, #tpu.memory_space<vmem>>, vector<64x64xbf16>
    %cst_8 = arith.constant dense<0.000000e+00> : vector<8x64xf32>
    %11 = tpu.matmul %9, %10, %cst_8 {dimension_numbers = #tpu.dot_dimension_numbers<[1], [0], [0], [1], [0, 0, 1, 1], [], []>} : vector<8x64xbf16>, vector<64x64xbf16>, vector<8x64xf32> -> vector<8x64xf32>
    %c0_9 = arith.constant 0 : index
    %c0_10 = arith.constant 0 : index
    %12 = vector.load %arg5[%c0_9, %c0_10] : memref<1x64xf32, #tpu.memory_space<vmem>>, vector<1x64xf32>
    %13 = vector.broadcast %12 : vector<1x64xf32> to vector<8x64xf32>
    %14 = arith.addf %11, %13 : vector<8x64xf32>
    %cst_11 = arith.constant 0.000000e+00 : f32
    %15 = vector.broadcast %cst_11 : f32 to vector<8x64xf32>
    %16 = arith.maximumf %14, %15 : vector<8x64xf32>
    %17 = arith.truncf %16 : vector<8x64xf32> to vector<8x64xbf16>
    %c0_12 = arith.constant 0 : index
    %c0_13 = arith.constant 0 : index
    %18 = vector.load %arg6[%c0_12, %c0_13] : memref<64x4xbf16, #tpu.memory_space<vmem>>, vector<64x4xbf16>
    %cst_14 = arith.constant dense<0.000000e+00> : vector<8x4xf32>
    %19 = tpu.matmul %17, %18, %cst_14 {dimension_numbers = #tpu.dot_dimension_numbers<[1], [0], [0], [1], [0, 0, 1, 1], [], []>} : vector<8x64xbf16>, vector<64x4xbf16>, vector<8x4xf32> -> vector<8x4xf32>
    %c0_15 = arith.constant 0 : index
    %c0_16 = arith.constant 0 : index
    %20 = vector.load %arg7[%c0_15, %c0_16] : memref<1x4xf32, #tpu.memory_space<vmem>>, vector<1x4xf32>
    %21 = vector.broadcast %20 : vector<1x4xf32> to vector<8x4xf32>
    %22 = arith.addf %19, %21 : vector<8x4xf32>
    %cst_17 = arith.constant dense<0xFF800000> : vector<8xf32>
    %23 = vector.multi_reduction <maximumf>, %22, %cst_17 [1] : vector<8x4xf32> to vector<8xf32>
    %24 = vector.shape_cast %23 : vector<8xf32> to vector<8x1xf32>
    %25 = vector.broadcast %24 : vector<8x1xf32> to vector<8x4xf32>
    %26 = arith.subf %22, %25 : vector<8x4xf32>
    %27 = math.exp %26 : vector<8x4xf32>
    %cst_18 = arith.constant dense<0.000000e+00> : vector<8xf32>
    %28 = vector.multi_reduction <add>, %27, %cst_18 [1] : vector<8x4xf32> to vector<8xf32>
    %29 = vector.shape_cast %28 : vector<8xf32> to vector<8x1xf32>
    %30 = tpu.reciprocal %29 {approx = true} : vector<8x1xf32> -> vector<8x1xf32>
    %31 = vector.broadcast %30 : vector<8x1xf32> to vector<8x4xf32>
    %32 = arith.mulf %27, %31 : vector<8x4xf32>
    %c0_19 = arith.constant 0 : index
    %c0_20 = arith.constant 0 : index
    %33 = vector.load %arg8[%c0_19, %c0_20] : memref<8x4xf32, #tpu.memory_space<vmem>>, vector<8x4xf32>
    tpu.vector_store %arg8[%c0_19, %c0_20], %32 {strides = array<i32>} : memref<8x4xf32, #tpu.memory_space<vmem>>, vector<8x4xf32>,
    return
  }
  func.func @transform_0(%arg0: i32) -> (i32, i32) {
    %c0_i32 = arith.constant 0 : i32
    %c0_i32_0 = arith.constant 0 : i32
    return %arg0, %c0_i32 : i32, i32
  }
  func.func @transform_1(%arg0: i32) -> (i32, i32) {
    %c0_i32 = arith.constant 0 : i32
    %c0_i32_0 = arith.constant 0 : i32
    %c0_i32_1 = arith.constant 0 : i32
    return %c0_i32, %c0_i32_0 : i32, i32
  }
  func.func @transform_2(%arg0: i32) -> (i32, i32) {
    %c0_i32 = arith.constant 0 : i32
    %c0_i32_0 = arith.constant 0 : i32
    %c0_i32_1 = arith.constant 0 : i32
    return %c0_i32, %c0_i32_0 : i32, i32
  }
  func.func @transform_3(%arg0: i32) -> (i32, i32) {
    %c0_i32 = arith.constant 0 : i32
    %c0_i32_0 = arith.constant 0 : i32
    %c0_i32_1 = arith.constant 0 : i32
    return %c0_i32, %c0_i32_0 : i32, i32
  }
  func.func @transform_4(%arg0: i32) -> (i32, i32) {
    %c0_i32 = arith.constant 0 : i32
    %c0_i32_0 = arith.constant 0 : i32
    %c0_i32_1 = arith.constant 0 : i32
    return %c0_i32, %c0_i32_0 : i32, i32
  }
  func.func @transform_5(%arg0: i32) -> (i32, i32) {
    %c0_i32 = arith.constant 0 : i32
    %c0_i32_0 = arith.constant 0 : i32
    %c0_i32_1 = arith.constant 0 : i32
    return %c0_i32, %c0_i32_0 : i32, i32
  }
  func.func @transform_6(%arg0: i32) -> (i32, i32) {
    %c0_i32 = arith.constant 0 : i32
    %c0_i32_0 = arith.constant 0 : i32
    %c0_i32_1 = arith.constant 0 : i32
    return %c0_i32, %c0_i32_0 : i32, i32
  }
  func.func @transform_7(%arg0: i32) -> (i32, i32) {
    %c0_i32 = arith.constant 0 : i32
    %c0_i32_0 = arith.constant 0 : i32
    return %arg0, %c0_i32 : i32, i32
  }
}

</mosaic_0001>

<bundles_post_ra>
// kernel: qnetwork_forward.1
= control target key start
LH: loop header
LB: loop body
LE: loop exit
PB: predicated region body
PF: predicated region fallthrough
CT: control target
= control target key end

     0   :  { %vm49_vm0 = vcmask 261120   ;;  %vm104_vm1 = vcmask 523264   ;;  %vm175_vm2 = vcmask 31744   ;;  %s340_s1 = inlined_call_operand.vmem [shape: bf16[32,64], index: 1, kind: input, shape index: {}]   ;;  %s341_s0 = inlined_call_operand.vmem [shape: f32[8,32], index: 0, kind: input, shape index: {}]   ;;  %s342_s3 = inlined_call_operand.vmem [shape: bf16[64,64], index: 3, kind: input, shape index: {}]   ;;  %s343_s2 = inlined_call_operand.vmem [shape: f32[1,64], index: 2, kind: input, shape index: {}]   ;;  %s344_s4 = inlined_call_operand.vmem [shape: f32[1,64], index: 4, kind: input, shape index: {}]   ;;  %s345_s5 = inlined_call_operand.vmem [shape: bf16[64,4], index: 5, kind: input, shape index: {}]   ;;  %s346_s6 = inlined_call_operand.vmem [shape: f32[1,4], index: 6, kind: input, shape index: {}]   ;;  %s347_s7 = inlined_call_operand.vmem [shape: f32[8,4], index: 7, kind: output, shape index: {}]  }
   0x1   :  { %v236_v0 = vld [vmem:[%s340_s1 + $0x8] sm:$0xff]  ;;  %v240_v1 = vld [vmem:[%s342_s3 + $0x18] sm:$0xff]  ;;  %v235_v2 = vld [vmem:[%s340_s1] sm:$0xff] }
   0x2   :  { %59 = vmatpush.bf16.msra.mxu0 %v236_v0  ;;  %v27_v3 = vld [vmem:[%s341_s0] sm:$0xff]  ;;  %112 = vmatpush.bf16.msra.mxu1 %v240_v1  ;;  %v239_v4 = vld [vmem:[%s342_s3 + $0x10] sm:$0xff]  ;;  %v238_v6 = vld [vmem:[%s342_s3 + $0x8] sm:$0xff] }
   0x3   :  { %v28_v5 = vpack.c.bf16 %v27_v3, %v27_v3  ;;  %v237_v7 = vld [vmem:[%s342_s3] sm:$0xff]  ;;  %v244_v8 = vld [vmem:[%s345_s5 + $0x18] sm:$0xff]  ;;  %v243_v9 = vld [vmem:[%s345_s5 + $0x10] sm:$0xff] }
   0x4   :  { %166 = vmatpush.bf16.msra.mxu2 %v244_v8  ;;  %v245_v10 = vld [vmem:[%s343_s2] ss:$0 sm:$0xff]  ;;  %v242_v16 = vld [vmem:[%s345_s5 + $0x8] sm:$0xff] }
   0x5   :  { %v241_v17 = vld [vmem:[%s345_s5] sm:$0xff] }
   0x6   :  { %60 = vmatpush.bf16.msra.mxu0 %v235_v2  ;;  %113 = vmatpush.bf16.msra.mxu1 %v239_v4  ;;  %v246_v18 = vld [vmem:[%s344_s4] ss:$0 sm:$0xff] }
   0x7   :  { %v247_v24 = vld [vmem:[%s346_s6] ss:$0 sm:$0xff] }
   0x8   :  { %167 = vmatpush.bf16.msra.mxu2 %v243_v9 }
   0x9   :  { %200 = vmatmul.msk.bf16.vlgmr.msra.gmra.mxu0 %vm49_vm0, %v28_v5 }
   0xa   :  { %114 = vmatpush.bf16.msra.mxu1 %v238_v6 }
   0xc   :  { %168 = vmatpush.bf16.msra.mxu2 %v242_v16 }
   0xe   :  { %115 = vmatpush.bf16.msra.mxu1 %v237_v7 }
  0x10   :  { %169 = vmatpush.bf16.msra.mxu2 %v241_v17 }
  0x86   :  { %v62_v11 = vpop.f32.mrf.mxu0 }
  0x87   :  { %v63_v12 = vadd.f32 %v245_v10, %v62_v11 }
  0x89   :  { %v66_v13 = vmax.f32 %v63_v12, 0.0 }
  0x8b   :  { %v67_v14 = vpack.c.bf16 %v66_v13, %v66_v13 }
  0x8d   :  { %217 = vmatmul.msk.bf16.vlgmr.msra.gmra.mxu1 %vm104_vm1, %v67_v14 }
  0x8e   :  { %v64_v15 = vpop.f32.mrf.mxu0 }
 0x10a   :  { %v117_v19 = vpop.f32.mrf.mxu1 }
 0x10b   :  { %v118_v20 = vadd.f32 %v246_v18, %v117_v19 }
 0x10d   :  { %v121_v21 = vmax.f32 %v118_v20, 0.0 }
 0x10f   :  { %v122_v22 = vpack.c.bf16 %v121_v21, %v121_v21 }
 0x111   :  { %234 = vmatmul.msk.bf16.vlgmr.msra.gmra.mxu2 %vm104_vm1, %v122_v22 }
 0x112   :  { %v119_v23 = vpop.f32.mrf.mxu1 }
 0x194   :  { %v171_v25 = vpop.f32.mrf.mxu2 }
 0x195   :  { %v172_v26 = vadd.f32 %v247_v24, %v171_v25 }
 0x197   :  { %v176_v27 = vsel %vm175_vm2, %v172_v26, -inf }
 0x198   :  { %177 = vmax.xlane.f32.xlu0 %v176_v27 }
 0x19c   :  { %v173_v28 = vpop.f32.mrf.mxu2 }
 0x20b   :  { %v178_v29 = vpop.xlane.xlu0 %177 }
 0x20c   :  { %v179_v30 = vsub.f32 %v172_v26, %v178_v29 }
 0x20e   :  { %v180_v31 = vmul.f32 1.442695, %v179_v30 }
 0x210   :  { %248 = vpow2.f32 %v180_v31 }
 0x216   :  { %v249_v32 = vpop.eup %248 }
 0x217   :  { %v182_v33 = vsel %vm175_vm2, %v249_v32, 0.0 }
 0x218   :  { %183 = vadd.xlane.f32.xlu0 %v182_v33 }
 0x28b   :  { %v184_v34 = vpop.xlane.xlu0 %183 }
 0x28c   :  { %250 = vrcp.f32 %v184_v34 }
 0x292   :  { %v251_v35 = vpop.eup %250 }
 0x293   :  { %v186_v36 = vmul.f32 %v251_v35, %v249_v32 }
 0x295   :  { %187 = vst.msk [vmem:[%s347_s7] sm:$0xff] %vm175_vm2, %v186_v36 }

</bundles_post_ra>
